<compile_context>
chip_gen: v7x
topology: tpu7x:2x2x1
jax: 0.10.0
libtpu: 0.0.40
codegen_flags: <defaults>
</compile_context>

<pallas_src>
import numpy as np
import jax
import jax.numpy as jnp
from jax import lax
from jax.experimental import pallas as pl
from jax.experimental.pallas import tpu as pltpu


# ----------------------------------------------------------------------------
# Fused Pallas kernel: one Speller decode step
# ----------------------------------------------------------------------------
def _speller_step_kernel(tok_ref, len_ref,
                         h1_ref, c1_ref, h2_ref, c2_ref, ctx_ref,
                         keys_ref, values_ref,
                         emb_ref, w1_ref, b1_ref, w2_ref, b2_ref,
                         wc_ref, bc_ref,
                         logits_ref, h1o_ref, c1o_ref, h2o_ref, c2o_ref,
                         ctxo_ref, attn_ref):
    """All refs live in VMEM.

    tok_ref    : (N, 1)  int32   input tokens
    len_ref    : (1, N)  int32   encoder valid lengths
    h1/c1      : (N, H)          LSTMCell1 state
    h2/c2      : (N, K)          LSTMCell2 state (K = key_size)
    ctx_ref    : (N, V)          previous attention context
    keys_ref   : (T, N, K)       encoder key projections
    values_ref : (T, N, V)       encoder value projections
    emb_ref    : (vocab, E)      embedding table (pad row is zero)
    w1_ref     : (E+V+H, 4H)     fused [W_ih^T ; W_hh^T] for LSTMCell1
    b1_ref     : (1, 4H)         b_ih + b_hh
    w2_ref     : (H+K, 4K)       fused weights for LSTMCell2
    b2_ref     : (1, 4K)
    wc_ref     : (K+V, vocab)    charProb weight (pre-transposed)
    bc_ref     : (1, vocab)
    outputs    : logits (N,vocab), new states, new context (N,V), attn (N,T)
    """
    N = tok_ref.shape[0]
    vocab = emb_ref.shape[0]
    H = h1_ref.shape[1]
    K = h2_ref.shape[1]
    T = keys_ref.shape[0]

    # --- embedding lookup via one-hot @ table (single MXU matmul) ---
    tok = tok_ref[...]                                            # (N, 1) int32
    onehot = (lax.broadcasted_iota(jnp.int32, (N, vocab), 1) == tok
              ).astype(jnp.float32)                               # (N, vocab)
    embed = jnp.dot(onehot, emb_ref[...],
                    preferred_element_type=jnp.float32)           # (N, E)

    ctx = ctx_ref[...]                                            # (N, V)

    # --- LSTMCell 1: fused [x | h] @ W  (gate order i, f, g, o) ---
    xh1 = jnp.concatenate([embed, ctx, h1_ref[...]], axis=1)      # (N, E+V+H)
    g1 = (jnp.dot(xh1, w1_ref[...], preferred_element_type=jnp.float32)
          + b1_ref[...])                                          # (N, 4H)
    i1 = jax.nn.sigmoid(g1[:, 0:H])
    f1 = jax.nn.sigmoid(g1[:, H:2 * H])
    gg1 = jnp.tanh(g1[:, 2 * H:3 * H])
    o1 = jax.nn.sigmoid(g1[:, 3 * H:4 * H])
    c1n = f1 * c1_ref[...] + i1 * gg1
    h1n = o1 * jnp.tanh(c1n)                                      # (N, H)

    # --- LSTMCell 2 ---
    xh2 = jnp.concatenate([h1n, h2_ref[...]], axis=1)             # (N, H+K)
    g2 = (jnp.dot(xh2, w2_ref[...], preferred_element_type=jnp.float32)
          + b2_ref[...])                                          # (N, 4K)
    i2 = jax.nn.sigmoid(g2[:, 0:K])
    f2 = jax.nn.sigmoid(g2[:, K:2 * K])
    gg2 = jnp.tanh(g2[:, 2 * K:3 * K])
    o2 = jax.nn.sigmoid(g2[:, 3 * K:4 * K])
    c2n = f2 * c2_ref[...] + i2 * gg2
    h2n = o2 * jnp.tanh(c2n)                                      # query (N, K)

    # --- length-masked dot-product attention ---
    keys = keys_ref[...]                                          # (T, N, K)
    vals = values_ref[...]                                        # (T, N, V)
    energy = jnp.sum(keys * h2n[None, :, :], axis=-1)             # (T, N)
    tpos = lax.broadcasted_iota(jnp.int32, (T, N), 0)
    valid = tpos < len_ref[...]                                   # (T, N) bool
    energy = jnp.where(valid, energy, -1e30)
    energy = energy - jnp.max(energy, axis=0, keepdims=True)
    p = jnp.exp(energy) * valid.astype(jnp.float32)               # exact 0 on pad
    attn_tn = p / jnp.sum(p, axis=0, keepdims=True)               # (T, N)
    ctx_new = jnp.sum(attn_tn[:, :, None] * vals, axis=0)         # (N, V)

    # --- character logits ---
    qc = jnp.concatenate([h2n, ctx_new], axis=1)                  # (N, K+V)
    logits_ref[...] = (jnp.dot(qc, wc_ref[...],
                               preferred_element_type=jnp.float32)
                       + bc_ref[...])

    h1o_ref[...] = h1n
    c1o_ref[...] = c1n
    h2o_ref[...] = h2n
    c2o_ref[...] = c2n
    ctxo_ref[...] = ctx_new
    attn_ref[...] = attn_tn.T                                     # (N, T)


# ----------------------------------------------------------------------------
# Python wrapper
# ----------------------------------------------------------------------------
_VMEM = pl.BlockSpec(memory_space=pltpu.MemorySpace.VMEM)


def _pallas_step(keys, values, tok, lengths, h1, c1, h2, c2, ctx, p):
    T, N, K = keys.shape
    V = values.shape[2]
    H = h1.shape[1]
    vocab = p["emb"].shape[0]
    out_shapes = (
        jax.ShapeDtypeStruct((N, vocab), jnp.float32),   # logits
        jax.ShapeDtypeStruct((N, H), jnp.float32),       # h1'
        jax.ShapeDtypeStruct((N, H), jnp.float32),       # c1'
        jax.ShapeDtypeStruct((N, K), jnp.float32),       # h2'
        jax.ShapeDtypeStruct((N, K), jnp.float32),       # c2'
        jax.ShapeDtypeStruct((N, V), jnp.float32),       # context'
        jax.ShapeDtypeStruct((N, T), jnp.float32),       # attn
    )
    return pl.pallas_call(
        _speller_step_kernel,
        out_shape=out_shapes,
        in_specs=[_VMEM] * 16,
        out_specs=(_VMEM,) * 7,
    )(tok.reshape(N, 1).astype(jnp.int32),
      lengths.reshape(1, N).astype(jnp.int32),
      h1, c1, h2, c2, ctx,
      keys, values,
      p["emb"], p["w1"], p["b1"], p["w2"], p["b2"], p["wc"], p["bc"])


_pallas_step_jit = jax.jit(_pallas_step)


def speller_forward(params, keys, values, tokens, src_lengths=None,
                    hidden_states=None, context=None):
    """Mirror of Speller.forward.

    keys   : (T, N, key_size)
    values : (T, N, value_size)
    tokens : (N,) int token ids (one decode step)
    returns (logits, [(h1,c1),(h2,c2)], context, attn)
    """
    T, N = keys.shape[:2]
    H = params["b1"].shape[1] // 4
    K = params["b2"].shape[1] // 4
    V = values.shape[2]

    if src_lengths is None:
        src_lengths = jnp.full((N,), T, dtype=jnp.int32)
    if hidden_states is None:
        hidden_states = [(jnp.zeros((N, H), jnp.float32),
                          jnp.zeros((N, H), jnp.float32)),
                         (jnp.zeros((N, K), jnp.float32),
                          jnp.zeros((N, K), jnp.float32))]
    if context is None:
        context = jnp.zeros((N, V), jnp.float32)

    (h1, c1), (h2, c2) = hidden_states
    logits, h1n, c1n, h2n, c2n, ctxn, attn = _pallas_step_jit(
        keys, values, tokens, src_lengths, h1, c1, h2, c2, context, params)
    return logits, [(h1n, c1n), (h2n, c2n)], ctxn, attn


# ----------------------------------------------------------------------------
# Deterministic parameter initialization (shapes from Speller.__init__)
# ----------------------------------------------------------------------------
def init_params(key, vocab_size, embedding_dims, speller_hidden_dims,
                key_size, value_size, pad_idx):
    H, K, E, V = speller_hidden_dims, key_size, embedding_dims, value_size
    ks = jax.random.split(key, 9)

    def u(k, shape, s):
        return jax.random.uniform(k, shape, jnp.float32, -s, s)

    emb = jax.random.normal(ks[0], (vocab_size, E), jnp.float32)
    emb = emb.at[pad_idx].set(0.0)            # nn.Embedding padding_idx row

    s1 = 1.0 / np.sqrt(H)
    w1 = u(ks[1], (E + V + H, 4 * H), s1)     # fused [W_ih^T ; W_hh^T]
    b1 = u(ks[2], (1, 4 * H), s1) + u(ks[3], (1, 4 * H), s1)

    s2 = 1.0 / np.sqrt(K)
    w2 = u(ks[4], (H + K, 4 * K), s2)
    b2 = u(ks[5], (1, 4 * K), s2) + u(ks[6], (1, 4 * K), s2)

    s3 = 1.0 / np.sqrt(K + V)
    wc = u(ks[7], (K + V, vocab_size), s3)
    bc = u(ks[8], (1, vocab_size), s3)
    return dict(emb=emb, w1=w1, b1=b1, w2=w2, b2=b2, wc=wc, bc=bc)


# ----------------------------------------------------------------------------
if __name__ == "__main__":
    key = jax.random.PRNGKey(0)

    vocab_size = 32
    embedding_dims = 32
    speller_hidden_dims = 64
    key_size = 16
    value_size = 16
    T, N = 8, 4
    pad_idx = 0

    kp, kk, kv, kt = jax.random.split(key, 4)
    params = init_params(kp, vocab_size, embedding_dims, speller_hidden_dims,
                         key_size, value_size, pad_idx)

    keys_enc = jax.random.normal(kk, (T, N, key_size), jnp.float32)
    values_enc = jax.random.normal(kv, (T, N, value_size), jnp.float32)
    tokens = jax.random.randint(kt, (N,), 0, vocab_size, dtype=jnp.int32)
    src_lengths = jnp.array([8, 6, 5, 3], dtype=jnp.int32)

    # step 1 (fresh state / zero context, like the first decoder step)
    logits, states, context, attn = speller_forward(
        params, keys_enc, values_enc, tokens, src_lengths)

    # step 2 reuses the returned state & context (greedy-decode style)
    next_tokens = jnp.argmax(logits, axis=-1).astype(jnp.int32)
    logits2, states2, context2, attn2 = speller_forward(
        params, keys_enc, values_enc, next_tokens, src_lengths,
        hidden_states=states, context=context)

    jax.block_until_ready((logits, attn, logits2, attn2))

    # --- sanity checks ---
    assert logits.shape == (N, vocab_size)
    assert attn.shape == (N, T)
    assert context.shape == (N, value_size)
    assert states[0][0].shape == (N, speller_hidden_dims)
    assert states[1][0].shape == (N, key_size)

    a = np.asarray(attn)
    L = np.asarray(src_lengths)
    np.testing.assert_allclose(a.sum(axis=1), 1.0, rtol=1e-5, atol=1e-5)
    for n in range(N):
        assert np.all(a[n, L[n]:] == 0.0), "attention leaked past src length"
    assert np.all(np.isfinite(np.asarray(logits)))
    assert np.all(np.isfinite(np.asarray(logits2)))

    print("KERNEL_OK")
</pallas_src>

<mosaic_0001>
module attributes {stable_mosaic.version = 11 : i64} {
  func.func @_speller_step_kernel(%arg0: memref<4x1xi32, #tpu.memory_space<vmem>>, %arg1: memref<1x4xi32, #tpu.memory_space<vmem>>, %arg2: memref<4x64xf32, #tpu.memory_space<vmem>>, %arg3: memref<4x64xf32, #tpu.memory_space<vmem>>, %arg4: memref<4x16xf32, #tpu.memory_space<vmem>>, %arg5: memref<4x16xf32, #tpu.memory_space<vmem>>, %arg6: memref<4x16xf32, #tpu.memory_space<vmem>>, %arg7: memref<8x4x16xf32, #tpu.memory_space<vmem>>, %arg8: memref<8x4x16xf32, #tpu.memory_space<vmem>>, %arg9: memref<32x32xf32, #tpu.memory_space<vmem>>, %arg10: memref<112x256xf32, #tpu.memory_space<vmem>>, %arg11: memref<1x256xf32, #tpu.memory_space<vmem>>, %arg12: memref<80x64xf32, #tpu.memory_space<vmem>>, %arg13: memref<1x64xf32, #tpu.memory_space<vmem>>, %arg14: memref<32x32xf32, #tpu.memory_space<vmem>>, %arg15: memref<1x32xf32, #tpu.memory_space<vmem>>, %arg16: memref<4x32xf32, #tpu.memory_space<vmem>>, %arg17: memref<4x64xf32, #tpu.memory_space<vmem>>, %arg18: memref<4x64xf32, #tpu.memory_space<vmem>>, %arg19: memref<4x16xf32, #tpu.memory_space<vmem>>, %arg20: memref<4x16xf32, #tpu.memory_space<vmem>>, %arg21: memref<4x16xf32, #tpu.memory_space<vmem>>, %arg22: memref<4x8xf32, #tpu.memory_space<vmem>>) attributes {dimension_semantics = [], scalar_prefetch = 0 : i64, scratch_operands = 0 : i64, tpu.core_type = #tpu.core_type<tc>} {
    %c0 = arith.constant 0 : index
    %c0_0 = arith.constant 0 : index
    %0 = vector.load %arg0[%c0, %c0_0] : memref<4x1xi32, #tpu.memory_space<vmem>>, vector<4x1xi32>
    %1 = tpu.iota {dimensions = array<i32: 1>} : vector<4x32xi32>
    %2 = vector.broadcast %0 : vector<4x1xi32> to vector<4x32xi32>
    %3 = arith.cmpi eq, %1, %2 : vector<4x32xi32>
    %4 = arith.extui %3 : vector<4x32xi1> to vector<4x32xi32>
    %5 = arith.sitofp %4 : vector<4x32xi32> to vector<4x32xf32>
    %c0_1 = arith.constant 0 : index
    %c0_2 = arith.constant 0 : index
    %6 = vector.load %arg9[%c0_1, %c0_2] : memref<32x32xf32, #tpu.memory_space<vmem>>, vector<32x32xf32>
    %cst = arith.constant dense<0.000000e+00> : vector<4x32xf32>
    %7 = tpu.matmul %5, %6, %cst {dimension_numbers = #tpu.dot_dimension_numbers<[1], [0], [0], [1], [0, 0, 1, 1], [], []>} : vector<4x32xf32>, vector<32x32xf32>, vector<4x32xf32> -> vector<4x32xf32>
    %c0_3 = arith.constant 0 : index
    %c0_4 = arith.constant 0 : index
    %8 = vector.load %arg6[%c0_3, %c0_4] : memref<4x16xf32, #tpu.memory_space<vmem>>, vector<4x16xf32>
    %c0_5 = arith.constant 0 : index
    %c0_6 = arith.constant 0 : index
    %9 = vector.load %arg2[%c0_5, %c0_6] : memref<4x64xf32, #tpu.memory_space<vmem>>, vector<4x64xf32>
    %10 = tpu.concatenate %7, %8, %9 in 1 : vector<4x32xf32>, vector<4x16xf32>, vector<4x64xf32> -> vector<4x112xf32>
    %c0_7 = arith.constant 0 : index
    %c0_8 = arith.constant 0 : index
    %11 = vector.load %arg10[%c0_7, %c0_8] : memref<112x256xf32, #tpu.memory_space<vmem>>, vector<112x256xf32>
    %cst_9 = arith.constant dense<0.000000e+00> : vector<4x256xf32>
    %12 = tpu.matmul %10, %11, %cst_9 {dimension_numbers = #tpu.dot_dimension_numbers<[1], [0], [0], [1], [0, 0, 1, 1], [], []>} : vector<4x112xf32>, vector<112x256xf32>, vector<4x256xf32> -> vector<4x256xf32>
    %c0_10 = arith.constant 0 : index
    %c0_11 = arith.constant 0 : index
    %13 = vector.load %arg11[%c0_10, %c0_11] : memref<1x256xf32, #tpu.memory_space<vmem>>, vector<1x256xf32>
    %14 = vector.broadcast %13 : vector<1x256xf32> to vector<4x256xf32>
    %15 = arith.addf %12, %14 : vector<4x256xf32>
    %16 = vector.extract_strided_slice %15 {offsets = [0, 0], sizes = [4, 64], strides = [1, 1]} : vector<4x256xf32> to vector<4x64xf32>
    %17 = arith.negf %16 : vector<4x64xf32>
    %18 = math.exp %17 : vector<4x64xf32>
    %cst_12 = arith.constant 1.000000e+00 : f32
    %19 = vector.broadcast %cst_12 : f32 to vector<4x64xf32>
    %20 = arith.addf %19, %18 : vector<4x64xf32>
    %21 = arith.divf %19, %20 : vector<4x64xf32>
    %22 = vector.extract_strided_slice %15 {offsets = [0, 64], sizes = [4, 64], strides = [1, 1]} : vector<4x256xf32> to vector<4x64xf32>
    %23 = arith.negf %22 : vector<4x64xf32>
    %24 = math.exp %23 : vector<4x64xf32>
    %cst_13 = arith.constant 1.000000e+00 : f32
    %25 = vector.broadcast %cst_13 : f32 to vector<4x64xf32>
    %26 = arith.addf %25, %24 : vector<4x64xf32>
    %27 = arith.divf %25, %26 : vector<4x64xf32>
    %28 = vector.extract_strided_slice %15 {offsets = [0, 128], sizes = [4, 64], strides = [1, 1]} : vector<4x256xf32> to vector<4x64xf32>
    %29 = math.tanh %28 : vector<4x64xf32>
    %30 = vector.extract_strided_slice %15 {offsets = [0, 192], sizes = [4, 64], strides = [1, 1]} : vector<4x256xf32> to vector<4x64xf32>
    %31 = arith.negf %30 : vector<4x64xf32>
    %32 = math.exp %31 : vector<4x64xf32>
    %cst_14 = arith.constant 1.000000e+00 : f32
    %33 = vector.broadcast %cst_14 : f32 to vector<4x64xf32>
    %34 = arith.addf %33, %32 : vector<4x64xf32>
    %35 = arith.divf %33, %34 : vector<4x64xf32>
    %c0_15 = arith.constant 0 : index
    %c0_16 = arith.constant 0 : index
    %36 = vector.load %arg3[%c0_15, %c0_16] : memref<4x64xf32, #tpu.memory_space<vmem>>, vector<4x64xf32>
    %37 = arith.mulf %27, %36 : vector<4x64xf32>
    %38 = arith.mulf %21, %29 : vector<4x64xf32>
    %39 = arith.addf %37, %38 : vector<4x64xf32>
    %40 = math.tanh %39 : vector<4x64xf32>
    %41 = arith.mulf %35, %40 : vector<4x64xf32>
    %c0_17 = arith.constant 0 : index
    %c0_18 = arith.constant 0 : index
    %42 = vector.load %arg4[%c0_17, %c0_18] : memref<4x16xf32, #tpu.memory_space<vmem>>, vector<4x16xf32>
    %43 = tpu.concatenate %41, %42 in 1 : vector<4x64xf32>, vector<4x16xf32> -> vector<4x80xf32>
    %c0_19 = arith.constant 0 : index
    %c0_20 = arith.constant 0 : index
    %44 = vector.load %arg12[%c0_19, %c0_20] : memref<80x64xf32, #tpu.memory_space<vmem>>, vector<80x64xf32>
    %cst_21 = arith.constant dense<0.000000e+00> : vector<4x64xf32>
    %45 = tpu.matmul %43, %44, %cst_21 {dimension_numbers = #tpu.dot_dimension_numbers<[1], [0], [0], [1], [0, 0, 1, 1], [], []>} : vector<4x80xf32>, vector<80x64xf32>, vector<4x64xf32> -> vector<4x64xf32>
    %c0_22 = arith.constant 0 : index
    %c0_23 = arith.constant 0 : index
    %46 = vector.load %arg13[%c0_22, %c0_23] : memref<1x64xf32, #tpu.memory_space<vmem>>, vector<1x64xf32>
    %47 = vector.broadcast %46 : vector<1x64xf32> to vector<4x64xf32>
    %48 = arith.addf %45, %47 : vector<4x64xf32>
    %49 = vector.extract_strided_slice %48 {offsets = [0, 0], sizes = [4, 16], strides = [1, 1]} : vector<4x64xf32> to vector<4x16xf32>
    %50 = arith.negf %49 : vector<4x16xf32>
    %51 = math.exp %50 : vector<4x16xf32>
    %cst_24 = arith.constant 1.000000e+00 : f32
    %52 = vector.broadcast %cst_24 : f32 to vector<4x16xf32>
    %53 = arith.addf %52, %51 : vector<4x16xf32>
    %54 = arith.divf %52, %53 : vector<4x16xf32>
    %55 = vector.extract_strided_slice %48 {offsets = [0, 16], sizes = [4, 16], strides = [1, 1]} : vector<4x64xf32> to vector<4x16xf32>
    %56 = arith.negf %55 : vector<4x16xf32>
    %57 = math.exp %56 : vector<4x16xf32>
    %cst_25 = arith.constant 1.000000e+00 : f32
    %58 = vector.broadcast %cst_25 : f32 to vector<4x16xf32>
    %59 = arith.addf %58, %57 : vector<4x16xf32>
    %60 = arith.divf %58, %59 : vector<4x16xf32>
    %61 = vector.extract_strided_slice %48 {offsets = [0, 32], sizes = [4, 16], strides = [1, 1]} : vector<4x64xf32> to vector<4x16xf32>
    %62 = math.tanh %61 : vector<4x16xf32>
    %63 = vector.extract_strided_slice %48 {offsets = [0, 48], sizes = [4, 16], strides = [1, 1]} : vector<4x64xf32> to vector<4x16xf32>
    %64 = arith.negf %63 : vector<4x16xf32>
    %65 = math.exp %64 : vector<4x16xf32>
    %cst_26 = arith.constant 1.000000e+00 : f32
    %66 = vector.broadcast %cst_26 : f32 to vector<4x16xf32>
    %67 = arith.addf %66, %65 : vector<4x16xf32>
    %68 = arith.divf %66, %67 : vector<4x16xf32>
    %c0_27 = arith.constant 0 : index
    %c0_28 = arith.constant 0 : index
    %69 = vector.load %arg5[%c0_27, %c0_28] : memref<4x16xf32, #tpu.memory_space<vmem>>, vector<4x16xf32>
    %70 = arith.mulf %60, %69 : vector<4x16xf32>
    %71 = arith.mulf %54, %62 : vector<4x16xf32>
    %72 = arith.addf %70, %71 : vector<4x16xf32>
    %73 = math.tanh %72 : vector<4x16xf32>
    %74 = arith.mulf %68, %73 : vector<4x16xf32>
    %c0_29 = arith.constant 0 : index
    %c0_30 = arith.constant 0 : index
    %c0_31 = arith.constant 0 : index
    %75 = vector.load %arg7[%c0_29, %c0_30, %c0_31] : memref<8x4x16xf32, #tpu.memory_space<vmem>>, vector<8x4x16xf32>
    %c0_32 = arith.constant 0 : index
    %c0_33 = arith.constant 0 : index
    %c0_34 = arith.constant 0 : index
    %76 = vector.load %arg8[%c0_32, %c0_33, %c0_34] : memref<8x4x16xf32, #tpu.memory_space<vmem>>, vector<8x4x16xf32>
    %77 = vector.shape_cast %74 : vector<4x16xf32> to vector<1x4x16xf32>
    %78 = vector.broadcast %77 : vector<1x4x16xf32> to vector<8x4x16xf32>
    %79 = arith.mulf %75, %78 : vector<8x4x16xf32>
    %cst_35 = arith.constant dense<0.000000e+00> : vector<8x4xf32>
    %80 = vector.multi_reduction <add>, %79, %cst_35 [2] : vector<8x4x16xf32> to vector<8x4xf32>
    %81 = tpu.iota {dimensions = array<i32: 0>} : vector<8x4xi32>
    %c0_36 = arith.constant 0 : index
    %c0_37 = arith.constant 0 : index
    %82 = vector.load %arg1[%c0_36, %c0_37] : memref<1x4xi32, #tpu.memory_space<vmem>>, vector<1x4xi32>
    %83 = vector.broadcast %82 : vector<1x4xi32> to vector<8x4xi32>
    %84 = arith.cmpi slt, %81, %83 : vector<8x4xi32>
    %cst_38 = arith.constant -1.000000e+30 : f32
    %85 = vector.broadcast %cst_38 : f32 to vector<8x4xf32>
    %86 = arith.select %84, %80, %85 : vector<8x4xi1>, vector<8x4xf32>
    %cst_39 = arith.constant dense<0xFF800000> : vector<4xf32>
    %87 = vector.multi_reduction <maximumf>, %86, %cst_39 [0] : vector<8x4xf32> to vector<4xf32>
    %88 = vector.shape_cast %87 : vector<4xf32> to vector<1x4xf32>
    %89 = vector.broadcast %88 : vector<1x4xf32> to vector<8x4xf32>
    %90 = arith.subf %86, %89 : vector<8x4xf32>
    %91 = math.exp %90 : vector<8x4xf32>
    %92 = arith.extui %84 : vector<8x4xi1> to vector<8x4xi32>
    %93 = arith.sitofp %92 : vector<8x4xi32> to vector<8x4xf32>
    %94 = arith.mulf %91, %93 : vector<8x4xf32>
    %cst_40 = arith.constant dense<0.000000e+00> : vector<4xf32>
    %95 = vector.multi_reduction <add>, %94, %cst_40 [0] : vector<8x4xf32> to vector<4xf32>
    %96 = vector.shape_cast %95 : vector<4xf32> to vector<1x4xf32>
    %97 = vector.broadcast %96 : vector<1x4xf32> to vector<8x4xf32>
    %98 = arith.divf %94, %97 : vector<8x4xf32>
    %99 = vector.shape_cast %98 : vector<8x4xf32> to vector<8x4x1xf32>
    %100 = vector.broadcast %99 : vector<8x4x1xf32> to vector<8x4x16xf32>
    %101 = arith.mulf %100, %76 : vector<8x4x16xf32>
    %cst_41 = arith.constant dense<0.000000e+00> : vector<4x16xf32>
    %102 = vector.multi_reduction <add>, %101, %cst_41 [0] : vector<8x4x16xf32> to vector<4x16xf32>
    %103 = tpu.concatenate %74, %102 in 1 : vector<4x16xf32>, vector<4x16xf32> -> vector<4x32xf32>
    %c0_42 = arith.constant 0 : index
    %c0_43 = arith.constant 0 : index
    %104 = vector.load %arg14[%c0_42, %c0_43] : memref<32x32xf32, #tpu.memory_space<vmem>>, vector<32x32xf32>
    %cst_44 = arith.constant dense<0.000000e+00> : vector<4x32xf32>
    %105 = tpu.matmul %103, %104, %cst_44 {dimension_numbers = #tpu.dot_dimension_numbers<[1], [0], [0], [1], [0, 0, 1, 1], [], []>} : vector<4x32xf32>, vector<32x32xf32>, vector<4x32xf32> -> vector<4x32xf32>
    %c0_45 = arith.constant 0 : index
    %c0_46 = arith.constant 0 : index
    %106 = vector.load %arg15[%c0_45, %c0_46] : memref<1x32xf32, #tpu.memory_space<vmem>>, vector<1x32xf32>
    %107 = vector.broadcast %106 : vector<1x32xf32> to vector<4x32xf32>
    %108 = arith.addf %105, %107 : vector<4x32xf32>
    %c0_47 = arith.constant 0 : index
    %c0_48 = arith.constant 0 : index
    %109 = vector.load %arg16[%c0_47, %c0_48] : memref<4x32xf32, #tpu.memory_space<vmem>>, vector<4x32xf32>
    tpu.vector_store %arg16[%c0_47, %c0_48], %108 {strides = array<i32>} : memref<4x32xf32, #tpu.memory_space<vmem>>, vector<4x32xf32>,
    %c0_49 = arith.constant 0 : index
    %c0_50 = arith.constant 0 : index
    %110 = vector.load %arg17[%c0_49, %c0_50] : memref<4x64xf32, #tpu.memory_space<vmem>>, vector<4x64xf32>
    tpu.vector_store %arg17[%c0_49, %c0_50], %41 {strides = array<i32>} : memref<4x64xf32, #tpu.memory_space<vmem>>, vector<4x64xf32>,
    %c0_51 = arith.constant 0 : index
    %c0_52 = arith.constant 0 : index
    %111 = vector.load %arg18[%c0_51, %c0_52] : memref<4x64xf32, #tpu.memory_space<vmem>>, vector<4x64xf32>
    tpu.vector_store %arg18[%c0_51, %c0_52], %39 {strides = array<i32>} : memref<4x64xf32, #tpu.memory_space<vmem>>, vector<4x64xf32>,
    %c0_53 = arith.constant 0 : index
    %c0_54 = arith.constant 0 : index
    %112 = vector.load %arg19[%c0_53, %c0_54] : memref<4x16xf32, #tpu.memory_space<vmem>>, vector<4x16xf32>
    tpu.vector_store %arg19[%c0_53, %c0_54], %74 {strides = array<i32>} : memref<4x16xf32, #tpu.memory_space<vmem>>, vector<4x16xf32>,
    %c0_55 = arith.constant 0 : index
    %c0_56 = arith.constant 0 : index
    %113 = vector.load %arg20[%c0_55, %c0_56] : memref<4x16xf32, #tpu.memory_space<vmem>>, vector<4x16xf32>
    tpu.vector_store %arg20[%c0_55, %c0_56], %72 {strides = array<i32>} : memref<4x16xf32, #tpu.memory_space<vmem>>, vector<4x16xf32>,
    %c0_57 = arith.constant 0 : index
    %c0_58 = arith.constant 0 : index
    %114 = vector.load %arg21[%c0_57, %c0_58] : memref<4x16xf32, #tpu.memory_space<vmem>>, vector<4x16xf32>
    tpu.vector_store %arg21[%c0_57, %c0_58], %102 {strides = array<i32>} : memref<4x16xf32, #tpu.memory_space<vmem>>, vector<4x16xf32>,
    %115 = tpu.transpose %98, [1, 0] : vector<8x4xf32> -> vector<4x8xf32>
    %c0_59 = arith.constant 0 : index
    %c0_60 = arith.constant 0 : index
    %116 = vector.load %arg22[%c0_59, %c0_60] : memref<4x8xf32, #tpu.memory_space<vmem>>, vector<4x8xf32>
    tpu.vector_store %arg22[%c0_59, %c0_60], %115 {strides = array<i32>} : memref<4x8xf32, #tpu.memory_space<vmem>>, vector<4x8xf32>,
    return
  }
}

</mosaic_0001>

<bundles_post_ra>
// kernel: _pallas_step.1
= control target key start
LH: loop header
LB: loop body
LE: loop exit
PB: predicated region body
PF: predicated region fallthrough
CT: control target
= control target key end

     0   :  { %s1920_s0 = inlined_call_operand.vmem [shape: s32[4,1], index: 0, kind: input, shape index: {}]   ;;  %s1921_s1 = inlined_call_operand.vmem [shape: s32[1,4], index: 1, kind: input, shape index: {}]   ;;  %s1922_s2 = inlined_call_operand.vmem [shape: f32[4,64], index: 2, kind: input, shape index: {}]   ;;  %s1923_s3 = inlined_call_operand.vmem [shape: f32[4,64], index: 3, kind: input, shape index: {}]   ;;  %s1924_s4 = inlined_call_operand.vmem [shape: f32[4,16], index: 4, kind: input, shape index: {}]   ;;  %s1925_s5 = inlined_call_operand.vmem [shape: f32[4,16], index: 5, kind: input, shape index: {}]   ;;  %s1926_s6 = inlined_call_operand.hbm [shape: f32[4,16], index: 6, kind: input, shape index: {}]   ;;  %s1927_s7 = inlined_call_operand.vmem [shape: f32[8,4,16], index: 7, kind: input, shape index: {}]   ;;  %s1928_s8 = inlined_call_operand.vmem [shape: f32[8,4,16], index: 8, kind: input, shape index: {}]   ;;  %s1929_s9 = inlined_call_operand.vmem [shape: f32[32,32], index: 9, kind: input, shape index: {}]   ;;  %s1930_s10 = inlined_call_operand.hbm [shape: f32[112,256], index: 10, kind: input, shape index: {}]   ;;  %s1931_s11 = inlined_call_operand.hbm [shape: f32[1,256], index: 11, kind: input, shape index: {}]   ;;  %s1932_s12 = inlined_call_operand.vmem [shape: f32[80,64], index: 12, kind: input, shape index: {}]   ;;  %s1933_s13 = inlined_call_operand.hbm [shape: f32[1,64], index: 13, kind: input, shape index: {}]   ;;  %s1934_s14 = inlined_call_operand.vmem [shape: f32[32,32], index: 14, kind: input, shape index: {}]   ;;  %s1935_s15 = inlined_call_operand.hbm [shape: f32[1,32], index: 15, kind: input, shape index: {}]   ;;  %s1936_s16 = inlined_call_operand.hbm [shape: f32[4,32], index: 16, kind: output, shape index: {0}]   ;;  %s1937_s17 = inlined_call_operand.hbm [shape: f32[4,64], index: 17, kind: output, shape index: {1}]   ;;  %s1938_s18 = inlined_call_operand.hbm [shape: f32[4,64], index: 18, kind: output, shape index: {2}]   ;;  %s1939_s19 = inlined_call_operand.hbm [shape: f32[4,16], index: 19, kind: output, shape index: {3}]   ;;  %s1940_s20 = inlined_call_operand.hbm [shape: f32[4,16], index: 20, kind: output, shape index: {4}]   ;;  %s1941_s21 = inlined_call_operand.hbm [shape: f32[4,16], index: 21, kind: output, shape index: {5}]   ;;  %s1942_s22 = inlined_call_operand.hbm [shape: f32[4,8], index: 22, kind: output, shape index: {6}]  }
   0x1   :  { %1945 = sst [smem:[#allocation28_spill]] %s1920_s0 }
   0x2   :  { %1946 = sst [smem:[#allocation29_spill]] %s1921_s1 }
   0x3   :  { %1947 = sst [smem:[#allocation30_spill]] %s1922_s2 }
   0x4   :  { %1948 = sst [smem:[#allocation31_spill]] %s1923_s3 }
   0x5   :  { %1949 = sst [smem:[#allocation32_spill]] %s1924_s4 }
   0x6   :  { %1950 = sst [smem:[#allocation33_spill]] %s1925_s5 }
   0x7   :  { %1951 = sst [smem:[#allocation34_spill]] %s1926_s6 }
   0x8   :  { %1952 = sst [smem:[#allocation35_spill]] %s1936_s16 }
   0x9   :  { %28 = vsyncpa [#allocation3], 0 }
   0xa   :  { %29 = vsyncpa [#allocation6], 0 }
   0xb   :  { %30 = vsyncpa [#allocation9], 0 }
   0xc   :  { %31 = vsyncpa [#allocation4], 0 }
   0xd   :  { %32 = vsyncpa [#allocation13], 0 }
   0xe   :  { %33 = vsyncpa [#allocation16], 0 }
   0xf   :  { %34 = vsyncpa [#allocation19], 0  ;;  %s1414_s3 = smov [#allocation5]   ;;  %s1136_s4 = scalar_lea.hbm %s1930_s10, 3584 }
  0x10   :  { %s68_s28 = sshll.u32 %s1414_s3, 4  ;;  %p1137_p0 = scmp.ne.s32.totalorder %s1930_s10, %s1136_s4  ;;  %s69_s28 = int_to_ptr.vmem [resolvable:$true] %s68_s28 }
  0x11   :  { %p1140_p1 = scmp.lt.u32.totalorder %s1136_s4, %s1930_s10 }
  0x13   :  { %p1142_p2 = pnand %p1140_p1, %p1137_p0 }
  0x15   :  { %1145 = shalt.err (!%p1142_p2)
}
  0x16   :  { %s1146_s24 = scalar_lea.vmem %s69_s28, 3584  ;;  %p1151_p4 = scmp.lt.s32.totalorder %s69_s28, %s69_s28 }
  0x17   :  { %p1147_p3 = scmp.ne.s32.totalorder %s69_s28, %s1146_s24  ;;  %p1152_p5 = scmp.lt.s32.totalorder %s1146_s24, %s1146_s24 }
  0x19   :  { %p1153_p6 = por %p1152_p5, %p1151_p4 }
  0x1b   :  { %p1154_p7 = pnand %p1153_p6, %p1147_p3 }
  0x1d   :  { %1157 = shalt.err (!%p1154_p7)
}
  0x1e   :  { %s1415_s6 = smov 256   ;;  %s1416_s25 = smov 16  }
  0x1f   :  { %74 = dma.hbm_to_vmem [thread:$0]  %s1930_s10, 3584, %s69_s28, [#allocation6], %s1415_s6, %s1415_s6, %s1416_s25  }
  0x20   :  { %s1417_s27 = smov [#allocation8]   ;;  %s1418_s29 = smov [#allocation2]  }
  0x21   :  { %s93_s3 = sshll.u32 %s1417_s27, 4  ;;  %s53_s30 = sshll.u32 %s1418_s29, 4  ;;  %s94_s3 = int_to_ptr.vmem [resolvable:$true] %s93_s3  ;;  %s54_s30 = int_to_ptr.vmem [resolvable:$true] %s53_s30 }
  0x22   :  { %s1158_s23 = scalar_lea.hbm %s1933_s13, 16 }
  0x23   :  { %p1159_p8 = scmp.ne.s32.totalorder %s1933_s13, %s1158_s23  ;;  %p1162_p9 = scmp.lt.u32.totalorder %s1158_s23, %s1933_s13 }
  0x25   :  { %p1164_p10 = pnand %p1162_p9, %p1159_p8 }
  0x27   :  { %1167 = shalt.err (!%p1164_p10)
}
  0x28   :  { %s1168_s10 = scalar_lea.vmem %s94_s3, 16  ;;  %s1172_s28 = scalar_lea.vmem %s94_s3, 32 }
  0x29   :  { %p1169_p11 = scmp.ne.s32.totalorder %s94_s3, %s1168_s10  ;;  %p1173_p12 = scmp.lt.s32.totalorder %s94_s3, %s94_s3 }
  0x2a   :  { %p1174_p13 = scmp.lt.s32.totalorder %s1172_s28, %s1168_s10 }
  0x2c   :  { %p1175_p0 = por %p1174_p13, %p1173_p12 }
  0x2e   :  { %p1176_p1 = pnand %p1175_p0, %p1169_p11 }
  0x30   :  { %1179 = shalt.err (!%p1176_p1)
}
  0x31   :  { %96 = dma.hbm_to_vmem [thread:$0]  %s1933_s13, 16, %s94_s3, [#allocation9]  }
  0x32   :  { %s1953_s29 = sld [smem:[#allocation34_spill]] }
  0x38   :  { %s1180_s16 = scalar_lea.hbm %s1953_s29, 64 }
  0x39   :  { %p1181_p2 = scmp.ne.s32.totalorder %s1953_s29, %s1180_s16  ;;  %p1184_p3 = scmp.lt.u32.totalorder %s1180_s16, %s1953_s29 }
  0x3b   :  { %p1186_p4 = pnand %p1184_p3, %p1181_p2 }
  0x3d   :  { %1189 = shalt.err (!%p1186_p4)
}
  0x3e   :  { %s1190_s5 = scalar_lea.vmem %s54_s30, 64  ;;  %p1195_p6 = scmp.lt.s32.totalorder %s54_s30, %s54_s30 }
  0x3f   :  { %p1191_p5 = scmp.ne.s32.totalorder %s54_s30, %s1190_s5  ;;  %p1196_p7 = scmp.lt.s32.totalorder %s1190_s5, %s1190_s5 }
  0x41   :  { %p1197_p8 = por %p1196_p7, %p1195_p6 }
  0x43   :  { %p1198_p9 = pnand %p1197_p8, %p1191_p5 }
  0x45   :  { %1201 = shalt.err (!%p1198_p9)
}
  0x46   :  { %56 = dma.hbm_to_vmem [thread:$0]  %s1953_s29, 64, %s54_s30, [#allocation3]  }
  0x47   :  { %s1419_s24 = smov [#allocation7]   ;;  %s1420_s28 = smov [#allocation10]  }
  0x48   :  { %s81_s10 = sshll.u32 %s1419_s24, 4  ;;  %s105_s6 = sshll.u32 %s1420_s28, 4  ;;  %s82_s10 = int_to_ptr.vmem [resolvable:$true] %s81_s10  ;;  %s106_s6 = int_to_ptr.vmem [resolvable:$true] %s105_s6 }
  0x49   :  { %s1202_s27 = scalar_lea.hbm %s1931_s11, 32 }
  0x4a   :  { %p1203_p10 = scmp.ne.s32.totalorder %s1931_s11, %s1202_s27  ;;  %p1206_p11 = scmp.lt.u32.totalorder %s1202_s27, %s1931_s11 }
  0x4c   :  { %p1208_p12 = pnand %p1206_p11, %p1203_p10 }
  0x4e   :  { %1211 = shalt.err (!%p1208_p12)
}
  0x4f   :  { %s1212_s30 = scalar_lea.vmem %s82_s10, 32  ;;  %p1217_p0 = scmp.lt.s32.totalorder %s82_s10, %s82_s10 }
  0x50   :  { %p1213_p13 = scmp.ne.s32.totalorder %s82_s10, %s1212_s30  ;;  %p1218_p1 = scmp.lt.s32.totalorder %s1212_s30, %s1212_s30 }
  0x52   :  { %p1219_p2 = por %p1218_p1, %p1217_p0 }
  0x54   :  { %p1220_p3 = pnand %p1219_p2, %p1213_p13 }
  0x56   :  { %1223 = shalt.err (!%p1220_p3)
}
  0x57   :  { %84 = dma.hbm_to_vmem [thread:$0]  %s1931_s11, 32, %s82_s10, [#allocation6]  }
  0x58   :  { %s1224_s3 = scalar_lea.hbm %s1935_s15, 16 }
  0x59   :  { %p1225_p4 = scmp.ne.s32.totalorder %s1935_s15, %s1224_s3  ;;  %p1228_p5 = scmp.lt.u32.totalorder %s1224_s3, %s1935_s15 }
  0x5b   :  { %p1230_p6 = pnand %p1228_p5, %p1225_p4 }
  0x5d   :  { %1233 = shalt.err (!%p1230_p6)
}
  0x5e   :  { %s1234_s27 = scalar_lea.vmem %s106_s6, 16  ;;  %s1238_s16 = scalar_lea.vmem %s106_s6, 32 }
  0x5f   :  { %p1235_p7 = scmp.ne.s32.totalorder %s106_s6, %s1234_s27  ;;  %p1239_p8 = scmp.lt.s32.totalorder %s106_s6, %s106_s6 }
  0x60   :  { %p1240_p9 = scmp.lt.s32.totalorder %s1238_s16, %s1234_s27 }
  0x62   :  { %p1241_p10 = por %p1240_p9, %p1239_p8 }
  0x64   :  { %p1242_p11 = pnand %p1241_p10, %p1235_p7 }
  0x66   :  { %1245 = shalt.err (!%p1242_p11)
}
  0x67   :  { %108 = dma.hbm_to_vmem [thread:$0]  %s1935_s15, 16, %s106_s6, [#allocation9]  }
  0x68   :  { %1400 = dma.done.wait [#allocation3], 64  }
  0x69   :  { %1401 = vsyncadd [#allocation3], 4294967232 }
  0x6a   :  { %1402 = dma.done.wait [#allocation6], 3616  }
  0x6b   :  { %1403 = vsyncadd [#allocation6], 4294963680 }
  0x6c   :  { %1404 = dma.done.wait [#allocation9], 32  }
  0x6d   :  { %1405 = vsyncadd [#allocation9], 4294967264  ;;  %v1421_v0 = vmov 0   ;;  %v1422_v1 = vmov 0.0|0.0   ;;  %v1423_v2 = vmov 0.0   ;;  %s1954_s23 = sld [smem:[#allocation28_spill]]  ;;  %v125_v51 = vlaneseq }
  0x6e   :  { %1111 = vset.pattern.permute.xlu0 %v1421_v0  ;;  %1032 = vmatprep.subr.bf16.mxu0 %v1422_v1  ;;  %v133_v4 = vld [vmem:[%s1929_s9] sm:$0xff]  ;;  %v134_v5 = vld [vmem:[%s1929_s9 + $0x8] sm:$0xff]  ;;  %v135_v7 = vld [vmem:[%s1929_s9 + $0x10] sm:$0xff]  ;;  %vm1424_vm0 = vmmov 0   ;;  %s1955_s26 = sld [smem:[#allocation30_spill]]  ;;  %s1425_s2 = smov 48  }
  0x6f   :  { %332 = vmatprep.mubr.f32.mxu1 %v1423_v2  ;;  %v1033_v6 = vpack.c.bf16 %v134_v5, %v133_v4  ;;  %v136_v8 = vld [vmem:[%s1929_s9 + $0x18] sm:$0xff]  ;;  %995 = vmatprep.mubr.msk.f32.mxu0 %vm1424_vm0, %v1423_v2  ;;  %v211_v10 = vld [vmem:[#allocation2] sm:$0xf]  ;;  %v225_v12 = vld [vmem:[#allocation5 + $0x8] sm:$0xff]  ;;  %s1426_s27 = smov 32   ;;  %v1639_v52 = vand.u32 127, %v125_v51 }
  0x70   :  { %v1036_v9 = vpack.c.bf16 %v136_v8, %v135_v7  ;;  %v227_v13 = vld [vmem:[#allocation5 + $0x18] sm:$0xff]  ;;  %v224_v14 = vld [vmem:[#allocation5] sm:$0xff]  ;;  %v226_v16 = vld [vmem:[#allocation5 + $0x10] sm:$0xff]  ;;  %vm137_vm1 = vcmask 261120   ;;  %s1956_s11 = sld [smem:[#allocation31_spill]]  ;;  %s1427_s10 = smov 64  }
  0x71   :  { %1034 = vmatpush3.bf16.msra.mxu0 %v1033_v6  ;;  %v1038_v15 = vpack.c.bf16 %v227_v13, %v225_v12  ;;  %v229_v17 = vld [vmem:[#allocation5 + $0x28] sm:$0xff]  ;;  %v231_v18 = vld [vmem:[#allocation5 + $0x38] sm:$0xff]  ;;  %v1040_v19 = vpack.c.bf16 %v226_v16, %v224_v14  ;;  %v228_v21 = vld [vmem:[#allocation5 + $0x20] sm:$0xff]  ;;  %vm222_vm3 = vcmask 392192   ;;  %vm264_vm4 = vcmask 916480   ;;  %s1958_s29 = sld [smem:[#allocation33_spill]] }
  0x72   :  { %1035 = vmatprep.subr.bf16.mxu0 %v1422_v1  ;;  %v1042_v20 = vpack.c.bf16 %v231_v18, %v229_v17  ;;  %v230_v22 = vld [vmem:[#allocation5 + $0x30] sm:$0xff]  ;;  %v233_v23 = vld [vmem:[#allocation5 + $0x48] sm:$0xff]  ;;  %v235_v24 = vld [vmem:[#allocation5 + $0x58] sm:$0xff]  ;;  %vm375_vm5 = vcmask 523264   ;;  %vm808_vm6 = vcmask 519168   ;;  %vm394_vm7 = vcmask 654336  }
  0x73   :  { %v124_v3 = vld [vmem:[%s1954_s23] sm:$0xf]  ;;  %1039 = vmatprep.subr.bf16.mxu1 %v1038_v15  ;;  %v1044_v25 = vpack.c.bf16 %v230_v22, %v228_v21  ;;  %v1046_v26 = vpack.c.bf16 %v235_v24, %v233_v23  ;;  %v232_v27 = vld [vmem:[#allocation5 + $0x40] sm:$0xff]  ;;  %v234_v28 = vld [vmem:[#allocation5 + $0x50] sm:$0xff]  ;;  %s1957_s23 = sld [smem:[#allocation32_spill]]  ;;  %s1428_s1 = smov 96  }
  0x74   :  { %128 = vperm.xlu0 %1111, %v124_v3   ;;  %v212_v11 = vld [vmem:[%s1955_s26] sm:$0xf]  ;;  %1041 = vmatpush1.bf16.msra.mxu1 %v1040_v19  ;;  %v237_v29 = vld [vmem:[#allocation5 + $0x68] sm:$0xff]  ;;  %v1048_v31 = vpack.c.bf16 %v234_v28, %v232_v27  ;;  %v236_v33 = vld [vmem:[#allocation5 + $0x60] sm:$0xff]  ;;  %v1651_v3 = vshrl.u32 %v125_v51, 7  ;;  %s1429_s5 = smov 80  }
  0x75   :  { %218 = vrot.lane.b32.xlu1 %v212_v11, %s1425_s2  ;;  %1037 = vmatpush3.bf16.msra.mxu0 %v1036_v9  ;;  %v239_v30 = vld [vmem:[#allocation5 + $0x78] sm:$0xff]  ;;  %v238_v34 = vld [vmem:[#allocation5 + $0x70] sm:$0xff]  ;;  %v241_v35 = vld [vmem:[#allocation5 + $0x88] sm:$0xff]  ;;  %vm525_vm8 = vcmask 125952   ;;  %vm598_vm9 = vcmask 1041409   ;;  %vm600_vm10 = vcmask 1042434  }
  0x76   :  { %1066 = vmatprep.subr.bf16.mxu0 %v1422_v1  ;;  %1043 = vmatprep.subr.bf16.mxu1 %v1042_v20  ;;  %v1050_v32 = vpack.c.bf16 %v239_v30, %v237_v29  ;;  %v243_v36 = vld [vmem:[#allocation5 + $0x98] sm:$0xff]  ;;  %v1052_v37 = vpack.c.bf16 %v238_v34, %v236_v33  ;;  %v240_v39 = vld [vmem:[#allocation5 + $0x80] sm:$0xff]  ;;  %v242_v40 = vld [vmem:[#allocation5 + $0x90] sm:$0xff]  ;;  %v256_v4 = vsub.s32 0, %v1651_v3  ;;  %v260_v11 = vsub.s32 1, %v1651_v3 }
  0x77   :  { %v1054_v38 = vpack.c.bf16 %v243_v36, %v241_v35  ;;  %v245_v41 = vld [vmem:[#allocation5 + $0xa8] sm:$0xff]  ;;  %v247_v42 = vld [vmem:[#allocation5 + $0xb8] sm:$0xff]  ;;  %v1056_v43 = vpack.c.bf16 %v242_v40, %v240_v39  ;;  %v244_v45 = vld [vmem:[#allocation5 + $0xa0] sm:$0xff]  ;;  %vm602_vm11 = vcmask 1043459   ;;  %vm604_vm12 = vcmask 1044484  }
  0x78   :  { %214 = vrot.lane.b32.xlu0 %v211_v10, %s1426_s27  ;;  %1045 = vmatpush1.bf16.msra.mxu1 %v1044_v25  ;;  %v1058_v44 = vpack.c.bf16 %v247_v42, %v245_v41  ;;  %v246_v46 = vld [vmem:[#allocation5 + $0xb0] sm:$0xff]  ;;  %v249_v47 = vld [vmem:[#allocation5 + $0xc8] sm:$0xff]  ;;  %v251_v48 = vld [vmem:[#allocation5 + $0xd8] sm:$0xff]  ;;  %vm606_vm13 = vcmask 1045509   ;;  %vm608_vm14 = vcmask 1046534   ;;  %vm610_vm15 = vcmask 1047559  }
  0x79   :  { %1047 = vmatprep.subr.bf16.mxu1 %v1046_v26  ;;  %v1060_v49 = vpack.c.bf16 %v246_v46, %v244_v45  ;;  %v1062_v50 = vpack.c.bf16 %v251_v48, %v249_v47  ;;  %v248_v55 = vld [vmem:[#allocation5 + $0xc0] sm:$0xff]  ;;  %v250_v56 = vld [vmem:[#allocation5 + $0xd0] sm:$0xff]  ;;  %v352_v58 = vld [vmem:[%s1956_s11] sm:$0xf] }
  0x7a   :  { %v1064_v57 = vpack.c.bf16 %v250_v56, %v248_v55  ;;  %354 = vrot.lane.b32.xlu1 %v352_v58, %s1427_s10  ;;  %v252_v5 = vld [vmem:[#allocation7] sm:$0x3]  ;;  %v366_v19 = vld [vmem:[%s1957_s23] sm:$0xf]  ;;  %v378_v21 = vld [vmem:[%s1932_s12 + $0x8] sm:$0xff] }
  0x7b   :  { %v257_v6 = vrot.slane %v252_v5, %v256_v4  ;;  %v261_v12 = vrot.slane %v252_v5, %v260_v11  ;;  %v377_v20 = vld [vmem:[%s1932_s12] sm:$0xff]  ;;  %v379_v22 = vld [vmem:[%s1932_s12 + $0x10] sm:$0xff]  ;;  %v380_v24 = vld [vmem:[%s1932_s12 + $0x18] sm:$0xff] }
  0x7c   :  { %1049 = vmatpush1.bf16.msra.mxu1 %v1048_v31  ;;  %v1067_v23 = vpack.c.bf16 %v378_v21, %v377_v20  ;;  %v1070_v25 = vpack.c.bf16 %v380_v24, %v379_v22  ;;  %v381_v26 = vld [vmem:[%s1932_s12 + $0x20] sm:$0xff]  ;;  %v382_v27 = vld [vmem:[%s1932_s12 + $0x28] sm:$0xff]  ;;  %v383_v29 = vld [vmem:[%s1932_s12 + $0x30] sm:$0xff] }
  0x7d   :  { %1051 = vmatprep.subr.bf16.mxu1 %v1050_v32  ;;  %v1073_v28 = vpack.c.bf16 %v382_v27, %v381_v26  ;;  %v384_v30 = vld [vmem:[%s1932_s12 + $0x38] sm:$0xff]  ;;  %v385_v32 = vld [vmem:[%s1932_s12 + $0x40] sm:$0xff]  ;;  %v386_v33 = vld [vmem:[%s1932_s12 + $0x48] sm:$0xff] }
  0x7e   :  { %v1076_v31 = vpack.c.bf16 %v384_v30, %v383_v29  ;;  %v1079_v34 = vpack.c.bf16 %v386_v33, %v385_v32  ;;  %v475_v42 = vld [vmem:[%s1958_s29] sm:$0xf]  ;;  %v503_v20 = vld [vmem:[%s1927_s7 + $0x18] sm:$0xf]  ;;  %v500_v21 = vld [vmem:[%s1927_s7 + $0xc] sm:$0xf] }
  0x7f   :  { %v502_v26 = vld [vmem:[%s1927_s7 + $0x14] sm:$0xf]  ;;  %v504_v30 = vld [vmem:[%s1927_s7 + $0x1c] sm:$0xf]  ;;  %s1959_s29 = sld [smem:[#allocation29_spill]] }
  0x80   :  { %1053 = vmatpush1.bf16.msra.mxu1 %v1052_v37 }
  0x81   :  { %1055 = vmatprep.subr.bf16.mxu1 %v1054_v38 }
  0x84   :  { %1057 = vmatpush1.bf16.msra.mxu1 %v1056_v43 }
  0x85   :  { %1059 = vmatprep.subr.bf16.mxu1 %v1058_v44 }
  0x88   :  { %1061 = vmatpush1.bf16.msra.mxu1 %v1060_v49  ;;  %v959_v49 = vld [vmem:[#allocation8] ss:$0 sm:$0xff] }
  0x89   :  { %1063 = vmatprep.subr.bf16.mxu1 %v1062_v50 }
  0x8c   :  { %1065 = vmatpush1.bf16.msra.mxu1 %v1064_v57 }
  0xe7   :  { %v219_v60 = vpop.permute.xlu1 %218 }
  0xec   :  { %v355_v37 = vpop.permute.xlu1 %354 }
  0xf3   :  { %v129_v53 = vpop.permute.xlu0 %128 }
  0xf4   :  { %vm130_vm2 = vcmp.eq.s32.totalorder %v1639_v52, %v129_v53 }
  0xf5   :  { %v954_v54 = vsel %vm130_vm2, 1.0, %v1423_v2  ;;  %vm614_vm2 = vcmask 31744  }
  0xf6   :  { %996 = vmatmul.mubr.msk.f32.vlgmr.msra.gmra.mrb[0].mxu0 %vm137_vm1, %v954_v54 }
  0xf7   :  { %1018 = vmatprep.mubr.msk.f32.mxu0 %vm1424_vm0, %v1423_v2  ;;  %v215_v59 = vpop.permute.xlu0 %214  ;;  %1068 = vmatpush3.bf16.msra.mxu0 %v1067_v23 }
  0xf8   :  { %1069 = vmatprep.subr.bf16.mxu0 %v1422_v1 }
  0xfb   :  { %1071 = vmatpush3.bf16.msra.mxu0 %v1070_v25 }
  0xfc   :  { %1072 = vmatprep.subr.bf16.mxu0 %v1422_v1 }
  0xff   :  { %1074 = vmatpush3.bf16.msra.mxu0 %v1073_v28 }
 0x100   :  { %1075 = vmatprep.subr.bf16.mxu0 %v1422_v1 }
 0x103   :  { %1077 = vmatpush3.bf16.msra.mxu0 %v1076_v31 }
 0x104   :  { %1078 = vmatprep.subr.bf16.mxu0 %v1422_v1 }
 0x107   :  { %1080 = vmatpush3.bf16.msra.mxu0 %v1079_v34 }
 0x108   :  { %1081 = vmatprep.subr.bf16.mxu0 %v1422_v1 }
 0x1c9   :  { %v207_v61 = vpop.f32.mrb[0].mxu0 }
 0x1ca   :  { %v221_v62 = vsel %vm137_vm1, %v207_v61, %v215_v59  ;;  %v997_v63 = vpop.f32.mrb[1].mxu0 }
 0x1cb   :  { %v223_v0 = vsel %vm222_vm3, %v221_v62, %v219_v60  ;;  %vm720_vm3 = vcmask 130048  }
 0x1cc   :  { %956 = vmatmul.mubr.msk.f32.vlgmr.msra.gmra.mrb[0].mxu1 %vm264_vm4, %v223_v0  ;;  %vm854_vm4 = vcmask 60416  }
 0x29f   :  { %v334_v7 = vpop.f32.mrb[0].mxu1 }
 0x2a0   :  { %v335_v8 = vadd.f32 %v334_v7, %v257_v6  ;;  %v336_v9 = vpop.f32.mrb[1].mxu1 }
 0x2a1   :  { %v337_v13 = vadd.f32 %v336_v9, %v261_v12  ;;  %v497_v9 = vld [vmem:[%s1927_s7] sm:$0xf]  ;;  %v501_v12 = vld [vmem:[%s1927_s7 + $0x10] sm:$0xf] }
 0x2a2   :  { %v957_v10 = vmul.f32 -1.442695, %v335_v8  ;;  %v498_v8 = vld [vmem:[%s1927_s7 + $0x4] sm:$0xf] }
 0x2a3   :  { %v958_v35 = vmul.f32 -1.442695, %v337_v13 }
 0x2a4   :  { %1112 = vpow2.f32 %v957_v10 }
 0x2a5   :  { %1114 = vtanh.f32 %v337_v13  ;;  %v499_v13 = vld [vmem:[%s1927_s7 + $0x8] sm:$0xf] }
 0x2ae   :  { %v1113_v14 = vpop.eup %1112 }
 0x2af   :  { %v342_v15 = vadd.f32 1.0, %v1113_v14  ;;  %v1115_v16 = vpop.eup %1114 }
 0x2b1   :  { %1116 = vrcp.f32 %v342_v15 }
 0x2b2   :  { %1118 = vpow2.f32 %v958_v35  ;;  %v568_v35 = vsub.s32 %v1639_v52, %v1651_v3 }
 0x2bb   :  { %v1117_v17 = vpop.eup %1116 }
 0x2bc   :  { %v358_v18 = vmul.f32 %v1117_v17, %v1115_v16  ;;  %v1119_v36 = vpop.eup %1118  ;;  %v357_v39 = vmul.f32 %v1117_v17, %v355_v37 }
 0x2bd   :  { %v349_v38 = vadd.f32 1.0, %v1119_v36 }
 0x2be   :  { %360 = vrot.lane.b32.xlu0 %v358_v18, %s1427_s10 }
 0x2bf   :  { %1120 = vrcp.f32 %v349_v38 }
 0x2c2   :  { %372 = vrot.lane.b32.xlu0 %v366_v19, %s1427_s10 }
 0x2c6   :  { %477 = vrot.lane.b32.xlu0 %v475_v42, %s1416_s25 }
 0x2c9   :  { %v1121_v43 = vpop.eup %1120 }
 0x330   :  { %v361_v40 = vpop.permute.xlu0 %360 }
 0x331   :  { %v1699_v41 = vadd.f32 %v361_v40, %v357_v39 }
 0x333   :  { %1122 = vtanh.f32 %v1699_v41 }
 0x334   :  { %v373_v46 = vpop.permute.xlu0 %372 }
 0x338   :  { %v478_v61 = vpop.permute.xlu0 %477 }
 0x33d   :  { %v1123_v44 = vpop.eup %1122 }
 0x33e   :  { %v365_v45 = vmul.f32 %v1123_v44, %v1121_v43 }
 0x340   :  { %368 = vrot.lane.b32.xlu1 %v365_v45, %s1427_s10 }
 0x3b2   :  { %v369_v47 = vpop.permute.xlu1 %368 }
 0x3b3   :  { %v376_v48 = vsel %vm375_vm5, %v369_v47, %v373_v46  ;;  %809 = vst.msk [vmem:[#allocation12] sm:$0xf] %vm808_vm6, %v369_v47 }
 0x3b4   :  { %1019 = vmatmul.mubr.msk.f32.vlgmr.msra.gmra.mrb[2].mxu0 %vm394_vm7, %v376_v48 }
 0x3b5   :  { %1029 = vmatprep.mubr.msk.f32.mxu0 %vm1424_vm0, %v1423_v2 }
 0x487   :  { %v464_v50 = vpop.f32.mrb[2].mxu0 }
 0x488   :  { %v465_v51 = vadd.f32 %v959_v49, %v464_v50  ;;  %v1020_v53 = vpop.f32.mrb[3].mxu0 }
 0x489   :  { %v962_v53 = vld [vmem:[%s1959_s29] ss:$0 sm:$0xff] }
 0x48a   :  { %1124 = vtanh.f32 %v465_v51  ;;  %v961_v55 = vmul.f32 -1.442695, %v465_v51  ;;  %vm557_vm0 = vcmp.lt.s32.totalorder %v1651_v3, %v962_v53  ;;  %v508_v53 = vld [vmem:[%s1928_s8 + $0xc] sm:$0xf] }
 0x48c   :  { %1126 = vpow2.f32 %v961_v55 }
 0x494   :  { %v1125_v54 = vpop.eup %1124 }
 0x495   :  { %482 = vrot.lane.b32.xlu1 %v1125_v54, %s1428_s1 }
 0x496   :  { %v1127_v56 = vpop.eup %1126 }
 0x497   :  { %v471_v57 = vadd.f32 1.0, %v1127_v56 }
 0x499   :  { %1128 = vrcp.f32 %v471_v57 }
 0x4a3   :  { %v1129_v58 = vpop.eup %1128 }
 0x4a4   :  { %v480_v62 = vmul.f32 %v1129_v58, %v478_v61 }
 0x507   :  { %v483_v59 = vpop.permute.xlu1 %482 }
 0x508   :  { %v485_v60 = vmul.f32 %v1129_v58, %v483_v59 }
 0x50a   :  { %487 = vrot.lane.b32.xlu1 %v485_v60, %s1416_s25 }
 0x57c   :  { %v488_v63 = vpop.permute.xlu1 %487 }
 0x57d   :  { %v1711_v0 = vadd.f32 %v488_v63, %v480_v62 }
 0x57f   :  { %1130 = vtanh.f32 %v1711_v0 }
 0x589   :  { %v1131_v5 = vpop.eup %1130 }
 0x58a   :  { %493 = vrot.lane.b32.xlu0 %v1131_v5, %s1426_s27 }
 0x5fc   :  { %v494_v6 = vpop.permute.xlu0 %493 }
 0x5fd   :  { %v496_v7 = vmul.f32 %v1129_v58, %v494_v6 }
 0x5ff   :  { %514 = vrot.lane.b32.xlu1 %v496_v7, %s1429_s5  ;;  %s1430_s5 = smov 112  }
 0x671   :  { %v1721_v10 = vpop.permute.xlu1 %514 }
 0x672   :  { %v518_v14 = vmul.f32 %v1721_v10, %v498_v8  ;;  %815 = vst.msk [vmem:[#allocation15] sm:$0xf] %vm525_vm8, %v1721_v10  ;;  %v517_v15 = vmul.f32 %v1721_v10, %v497_v9  ;;  %v521_v18 = vmul.f32 %v1721_v10, %v501_v12  ;;  %v519_v19 = vmul.f32 %v1721_v10, %v499_v13 }
 0x673   :  { %v523_v24 = vmul.f32 %v1721_v10, %v503_v20  ;;  %v520_v25 = vmul.f32 %v1721_v10, %v500_v21  ;;  %v522_v29 = vmul.f32 %v1721_v10, %v502_v26  ;;  %v524_v32 = vmul.f32 %v1721_v10, %v504_v30 }
 0x674   :  { %v529_v16 = vsel %vm525_vm8, %v518_v14, 0.0  ;;  %v526_v17 = vsel %vm525_vm8, %v517_v15, 0.0  ;;  %v538_v22 = vsel %vm525_vm8, %v521_v18, 0.0  ;;  %v532_v23 = vsel %vm525_vm8, %v519_v19, 0.0 }
 0x675   :  { %530 = vadd.xlane.f32.xlu1 %v529_v16  ;;  %527 = vadd.xlane.f32.xlu0 %v526_v17  ;;  %v544_v27 = vsel %vm525_vm8, %v523_v24, 0.0  ;;  %v535_v28 = vsel %vm525_vm8, %v520_v25, 0.0  ;;  %v541_v31 = vsel %vm525_vm8, %v522_v29, 0.0  ;;  %v547_v33 = vsel %vm525_vm8, %v524_v32, 0.0 }
 0x676   :  { %v963_v13 = vsel %vm557_vm0, 1.0, %v1423_v2  ;;  %v667_v2 = vsub.s32 4, %v1651_v3  ;;  %v681_v30 = vsub.s32 6, %v1651_v3 }
 0x679   :  { %539 = vadd.xlane.f32.xlu1 %v538_v22  ;;  %533 = vadd.xlane.f32.xlu0 %v532_v23 }
 0x67d   :  { %545 = vadd.xlane.f32.xlu1 %v544_v27  ;;  %536 = vadd.xlane.f32.xlu0 %v535_v28  ;;  %v653_v27 = vsub.s32 2, %v1651_v3 }
 0x681   :  { %542 = vadd.xlane.f32.xlu0 %v541_v31  ;;  %v660_v31 = vsub.s32 3, %v1651_v3 }
 0x685   :  { %548 = vadd.xlane.f32.xlu0 %v547_v33 }
 0x702   :  { %v528_v34 = vpop.xlane.xlu0 %527  ;;  %v531_v36 = vpop.xlane.xlu1 %530 }
 0x703   :  { %v573_v38 = vrot.slane %v531_v36, %v568_v35  ;;  %v569_v39 = vrot.slane %v528_v34, %v568_v35  ;;  %v688_v34 = vsub.s32 7, %v1651_v3  ;;  %v723_v36 = vld [vmem:[%s1934_s14 + $0x8] sm:$0xff] }
 0x705   :  { %v599_v44 = vsel %vm598_vm9, %v573_v38, %v569_v39  ;;  %v725_v39 = vld [vmem:[%s1934_s14 + $0x18] sm:$0xff] }
 0x706   :  { %v534_v37 = vpop.xlane.xlu0 %533  ;;  %v540_v42 = vpop.xlane.xlu1 %539 }
 0x707   :  { %v577_v40 = vrot.slane %v534_v37, %v568_v35  ;;  %v585_v48 = vrot.slane %v540_v42, %v568_v35  ;;  %v724_v37 = vld [vmem:[%s1934_s14 + $0x10] sm:$0xff]  ;;  %v506_v42 = vld [vmem:[%s1928_s8 + $0x4] sm:$0xf] }
 0x709   :  { %v601_v46 = vsel %vm600_vm10, %v577_v40, %v599_v44 }
 0x70a   :  { %v537_v43 = vpop.xlane.xlu0 %536  ;;  %v546_v50 = vpop.xlane.xlu1 %545 }
 0x70b   :  { %v581_v45 = vrot.slane %v537_v43, %v568_v35  ;;  %v593_v55 = vrot.slane %v546_v50, %v568_v35  ;;  %v505_v43 = vld [vmem:[%s1928_s8] sm:$0xf] }
 0x70d   :  { %v603_v47 = vsel %vm602_vm11, %v581_v45, %v601_v46 }
 0x70e   :  { %v543_v49 = vpop.xlane.xlu0 %542  ;;  %v605_v51 = vsel %vm604_vm12, %v585_v48, %v603_v47 }
 0x70f   :  { %v589_v52 = vrot.slane %v543_v49, %v568_v35 }
 0x711   :  { %v607_v54 = vsel %vm606_vm13, %v589_v52, %v605_v51  ;;  %v509_v51 = vld [vmem:[%s1928_s8 + $0x10] sm:$0xf] }
 0x712   :  { %v549_v56 = vpop.xlane.xlu0 %548  ;;  %v609_v58 = vsel %vm608_vm14, %v593_v55, %v607_v54 }
 0x713   :  { %v597_v57 = vrot.slane %v549_v56, %v568_v35  ;;  %v722_v35 = vld [vmem:[%s1934_s14] sm:$0xff] }
 0x714   :  { %v1082_v38 = vpack.c.bf16 %v723_v36, %v722_v35 }
 0x715   :  { %v611_v59 = vsel %vm610_vm15, %v597_v57, %v609_v58 }
 0x716   :  { %v613_v60 = vsel %vm557_vm0, %v611_v59, -1e+30  ;;  %1083 = vmatpush3.bf16.msra.mxu0 %v1082_v38 }
 0x717   :  { %v615_v61 = vsel %vm614_vm2, %v613_v60, -inf  ;;  %1084 = vmatprep.subr.bf16.mxu0 %v1422_v1  ;;  %v507_v1 = vld [vmem:[%s1928_s8 + $0x8] sm:$0xf] }
 0x718   :  { %v616_v62 = vrot.slane %v615_v61, 4 }
 0x71a   :  { %v617_v63 = vmax.f32 %v615_v61, %v616_v62  ;;  %v510_v62 = vld [vmem:[%s1928_s8 + $0x14] sm:$0xf] }
 0x71c   :  { %v618_v5 = vrot.slane %v617_v63, 2 }
 0x71e   :  { %v619_v6 = vmax.f32 %v617_v63, %v618_v5 }
 0x720   :  { %v620_v7 = vrot.slane %v619_v6, 1 }
 0x722   :  { %v621_v8 = vmax.f32 %v619_v6, %v620_v7 }
 0x724   :  { %v622_v9 = vsub.f32 %v613_v60, %v621_v8  ;;  %v511_v60 = vld [vmem:[%s1928_s8 + $0x18] sm:$0xf] }
 0x726   :  { %v623_v12 = vmul.f32 1.442695, %v622_v9 }
 0x728   :  { %1132 = vpow2.f32 %v623_v12 }
 0x732   :  { %v1133_v14 = vpop.eup %1132 }
 0x733   :  { %v627_v15 = vmul.f32 %v1133_v14, %v963_v13  ;;  %v512_v13 = vld [vmem:[%s1928_s8 + $0x1c] sm:$0xf]  ;;  %s1431_s8 = smov [#allocation12]  }
 0x734   :  { %s872_s13 = sshll.u32 %s1431_s8, 4  ;;  %s873_s13 = int_to_ptr.vmem [resolvable:$true] %s872_s13 }
 0x735   :  { %v628_v16 = vsel %vm614_vm2, %v627_v15, 0.0  ;;  %s1246_s24 = scalar_lea.vmem %s873_s13, 64  ;;  %p1251_p13 = scmp.lt.s32.totalorder %s873_s13, %s873_s13 }
 0x736   :  { %v629_v17 = vrot.slane %v628_v16, 4  ;;  %p1247_p12 = scmp.ne.s32.totalorder %s873_s13, %s1246_s24  ;;  %p1252_p0 = scmp.lt.s32.totalorder %s1246_s24, %s1246_s24 }
 0x738   :  { %v630_v18 = vadd.f32 %v629_v17, %v628_v16  ;;  %p1253_p1 = por %p1252_p0, %p1251_p13 }
 0x73a   :  { %v631_v19 = vrot.slane %v630_v18, 2  ;;  %p1254_p2 = pnand %p1253_p1, %p1247_p12 }
 0x73c   :  { %v632_v20 = vadd.f32 %v631_v19, %v630_v18 }
 0x73e   :  { %v633_v21 = vrot.slane %v632_v20, 1 }
 0x740   :  { %v634_v22 = vadd.f32 %v633_v21, %v632_v20 }
 0x742   :  { %1134 = vrcp.f32 %v634_v22 }
 0x74c   :  { %v1135_v23 = vpop.eup %1134 }
 0x74d   :  { %v636_v24 = vmul.f32 %v1135_v23, %v627_v15 }
 0x74f   :  { %v647_v25 = vrot.slane %v636_v24, %v260_v11  ;;  %v640_v26 = vrot.slane %v636_v24, %v256_v4  ;;  %v668_v28 = vrot.slane %v636_v24, %v667_v2  ;;  %v654_v29 = vrot.slane %v636_v24, %v653_v27 }
 0x750   :  { %v682_v32 = vrot.slane %v636_v24, %v681_v30  ;;  %v661_v33 = vrot.slane %v636_v24, %v660_v31  ;;  %v674_v11 = vsub.s32 5, %v1651_v3  ;;  %v689_v40 = vrot.slane %v636_v24, %v688_v34 }
 0x751   :  { %649 = vbcast.lane.b32.xlu0 %v647_v25, 256  ;;  %642 = vbcast.lane.b32.xlu1 %v640_v26, 256  ;;  %v1085_v3 = vpack.c.bf16 %v725_v39, %v724_v37 }
 0x752   :  { %v675_v4 = vrot.slane %v636_v24, %v674_v11 }
 0x753   :  { %1086 = vmatpush3.bf16.msra.mxu0 %v1085_v3 }
 0x755   :  { %670 = vbcast.lane.b32.xlu0 %v668_v28, 256  ;;  %656 = vbcast.lane.b32.xlu1 %v654_v29, 256 }
 0x759   :  { %684 = vbcast.lane.b32.xlu0 %v682_v32, 256  ;;  %663 = vbcast.lane.b32.xlu1 %v661_v33, 256 }
 0x75d   :  { %677 = vbcast.lane.b32.xlu1 %v675_v4, 256 }
 0x761   :  { %691 = vbcast.lane.b32.xlu1 %v689_v40, 256 }
 0x765   :  { %811 = vrot.lane.b32.xlu1 %v1699_v41, %s1427_s10 }
 0x78e   :  { %822 = vxpose.xlu1.b32.start.end [1/1] (short) (narrow) %v636_v24, 8 }
 0x7c3   :  { %v650_v44 = vpop.permute.xlu0 %649  ;;  %v643_v45 = vpop.permute.xlu1 %642 }
 0x7c4   :  { %v694_v46 = vmul.f32 %v650_v44, %v506_v42  ;;  %v693_v47 = vmul.f32 %v643_v45, %v505_v43 }
 0x7c6   :  { %v702_v41 = vsel %vm525_vm8, %v694_v46, 0.0  ;;  %v701_v50 = vsel %vm525_vm8, %v693_v47, 0.0 }
 0x7c7   :  { %v671_v48 = vpop.permute.xlu0 %670  ;;  %v657_v49 = vpop.permute.xlu1 %656  ;;  %v703_v55 = vadd.f32 %v702_v41, %v701_v50 }
 0x7c8   :  { %v695_v52 = vmul.f32 %v657_v49, %v507_v1  ;;  %v697_v57 = vmul.f32 %v671_v48, %v509_v51 }
 0x7ca   :  { %v704_v54 = vsel %vm525_vm8, %v695_v52, 0.0  ;;  %v708_v7 = vsel %vm525_vm8, %v697_v57, 0.0 }
 0x7cb   :  { %v664_v56 = vpop.permute.xlu1 %663  ;;  %v705_v59 = vadd.f32 %v704_v54, %v703_v55  ;;  %v685_v61 = vpop.permute.xlu0 %684 }
 0x7cc   :  { %v696_v58 = vmul.f32 %v664_v56, %v508_v53  ;;  %v699_v8 = vmul.f32 %v685_v61, %v511_v60 }
 0x7ce   :  { %v706_v63 = vsel %vm525_vm8, %v696_v58, 0.0  ;;  %v712_v17 = vsel %vm525_vm8, %v699_v8, 0.0 }
 0x7cf   :  { %v707_v5 = vadd.f32 %v706_v63, %v705_v59  ;;  %v678_v6 = vpop.permute.xlu1 %677 }
 0x7d0   :  { %v698_v9 = vmul.f32 %v678_v6, %v510_v62 }
 0x7d1   :  { %v709_v12 = vadd.f32 %v708_v7, %v707_v5 }
 0x7d2   :  { %v710_v14 = vsel %vm525_vm8, %v698_v9, 0.0 }
 0x7d3   :  { %v711_v15 = vadd.f32 %v710_v14, %v709_v12  ;;  %v692_v16 = vpop.permute.xlu1 %691 }
 0x7d4   :  { %v700_v18 = vmul.f32 %v692_v16, %v512_v13 }
 0x7d5   :  { %v713_v19 = vadd.f32 %v712_v17, %v711_v15 }
 0x7d6   :  { %v714_v20 = vsel %vm525_vm8, %v700_v18, 0.0 }
 0x7d7   :  { %v812_v21 = vpop.permute.xlu1 %811  ;;  %v715_v22 = vadd.f32 %v714_v20, %v713_v19 }
 0x7d8   :  { %814 = vst.msk [vmem:[#allocation14] sm:$0xf] %vm808_vm6, %v812_v21 }
 0x7d9   :  { %717 = vrot.lane.b32.xlu0 %v715_v22, %s1416_s25  ;;  %821 = vst.msk [vmem:[#allocation18] sm:$0xf] %vm525_vm8, %v715_v22  ;;  %s1432_s25 = smov [#allocation15]  }
 0x7da   :  { %s892_s3 = sshll.u32 %s1432_s25, 4  ;;  %s893_s3 = int_to_ptr.vmem [resolvable:$true] %s892_s3 }
 0x7dd   :  { %817 = vrot.lane.b32.xlu0 %v1711_v0, %s1430_s5 }
 0x80e   :  { %v838_v26 = vpop.trf.xlu1 }
 0x80f   :  { %855 = vst.msk [vmem:[#allocation20] sm:$0xf] %vm854_vm4, %v838_v26 }
 0x84b   :  { %v718_v23 = vpop.permute.xlu0 %717 }
 0x84c   :  { %v721_v24 = vsel %vm720_vm3, %v1721_v10, %v718_v23 }
 0x84d   :  { %1030 = vmatmul.mubr.msk.f32.vlgmr.msra.gmra.mrb[4].mxu0 %vm137_vm1, %v721_v24 }
 0x84f   :  { %v818_v25 = vpop.permute.xlu0 %817 }
 0x850   :  { %820 = vst.msk [vmem:[#allocation17] sm:$0xf] %vm525_vm8, %v818_v25 }
 0x851   :  { %1257 = shalt.err (!%p1254_p2)
}
 0x852   :  { %s1258_s2 = scalar_lea.hbm %s1937_s17, 64 }
 0x853   :  { %p1259_p3 = scmp.ne.s32.totalorder %s1937_s17, %s1258_s2  ;;  %p1262_p4 = scmp.lt.u32.totalorder %s1258_s2, %s1937_s17 }
 0x855   :  { %p1264_p5 = pnand %p1262_p4, %p1259_p3 }
 0x857   :  { %1267 = shalt.err (!%p1264_p5)
}
 0x858   :  { %875 = dma.vmem_to_hbm [thread:$0]  %s873_s13, 64, %s1937_s17, [#allocation13]  }
 0x859   :  { %s1268_s10 = scalar_lea.vmem %s893_s3, 64  ;;  %p1273_p7 = scmp.lt.s32.totalorder %s893_s3, %s893_s3 }
 0x85a   :  { %p1269_p6 = scmp.ne.s32.totalorder %s893_s3, %s1268_s10  ;;  %p1274_p8 = scmp.lt.s32.totalorder %s1268_s10, %s1268_s10 }
 0x85c   :  { %p1275_p9 = por %p1274_p8, %p1273_p7 }
 0x85e   :  { %p1276_p10 = pnand %p1275_p9, %p1269_p6 }
 0x860   :  { %1279 = shalt.err (!%p1276_p10)
}
 0x861   :  { %s1280_s30 = scalar_lea.hbm %s1939_s19, 64 }
 0x862   :  { %p1281_p11 = scmp.ne.s32.totalorder %s1939_s19, %s1280_s30  ;;  %p1284_p12 = scmp.lt.u32.totalorder %s1280_s30, %s1939_s19 }
 0x864   :  { %p1286_p13 = pnand %p1284_p12, %p1281_p11 }
 0x866   :  { %1289 = shalt.err (!%p1286_p13)
}
 0x867   :  { %895 = dma.vmem_to_hbm [thread:$0]  %s893_s3, 64, %s1939_s19, [#allocation16]  }
 0x868   :  { %s1433_s1 = smov [#allocation18]  }
 0x869   :  { %s912_s5 = sshll.u32 %s1433_s1, 4  ;;  %s913_s5 = int_to_ptr.vmem [resolvable:$true] %s912_s5 }
 0x86a   :  { %s1290_s8 = scalar_lea.vmem %s913_s5, 64  ;;  %p1295_p1 = scmp.lt.s32.totalorder %s913_s5, %s913_s5 }
 0x86b   :  { %p1291_p0 = scmp.ne.s32.totalorder %s913_s5, %s1290_s8  ;;  %p1296_p2 = scmp.lt.s32.totalorder %s1290_s8, %s1290_s8 }
 0x86d   :  { %p1297_p3 = por %p1296_p2, %p1295_p1 }
 0x86f   :  { %p1298_p4 = pnand %p1297_p3, %p1291_p0 }
 0x871   :  { %1301 = shalt.err (!%p1298_p4)
}
 0x872   :  { %s1302_s24 = scalar_lea.hbm %s1941_s21, 64 }
 0x873   :  { %p1303_p5 = scmp.ne.s32.totalorder %s1941_s21, %s1302_s24  ;;  %p1306_p6 = scmp.lt.u32.totalorder %s1302_s24, %s1941_s21 }
 0x875   :  { %p1308_p7 = pnand %p1306_p6, %p1303_p5 }
 0x877   :  { %1311 = shalt.err (!%p1308_p7)
}
 0x878   :  { %915 = dma.vmem_to_hbm [thread:$0]  %s913_s5, 64, %s1941_s21, [#allocation19]  }
 0x879   :  { %s1434_s9 = smov [#allocation14]   ;;  %s1435_s11 = smov [#allocation17]  }
 0x87a   :  { %s882_s16 = sshll.u32 %s1434_s9, 4  ;;  %s902_s14 = sshll.u32 %s1435_s11, 4  ;;  %s883_s16 = int_to_ptr.vmem [resolvable:$true] %s882_s16  ;;  %s903_s14 = int_to_ptr.vmem [resolvable:$true] %s902_s14 }
 0x87b   :  { %s1312_s4 = scalar_lea.vmem %s883_s16, 64  ;;  %p1317_p9 = scmp.lt.s32.totalorder %s883_s16, %s883_s16 }
 0x87c   :  { %p1313_p8 = scmp.ne.s32.totalorder %s883_s16, %s1312_s4  ;;  %p1318_p10 = scmp.lt.s32.totalorder %s1312_s4, %s1312_s4 }
 0x87e   :  { %p1319_p11 = por %p1318_p10, %p1317_p9 }
 0x880   :  { %p1320_p12 = pnand %p1319_p11, %p1313_p8 }
 0x882   :  { %1323 = shalt.err (!%p1320_p12)
}
 0x883   :  { %s1324_s23 = scalar_lea.hbm %s1938_s18, 64 }
 0x884   :  { %p1325_p13 = scmp.ne.s32.totalorder %s1938_s18, %s1324_s23  ;;  %p1328_p0 = scmp.lt.u32.totalorder %s1324_s23, %s1938_s18 }
 0x886   :  { %p1330_p1 = pnand %p1328_p0, %p1325_p13 }
 0x888   :  { %1333 = shalt.err (!%p1330_p1)
}
 0x889   :  { %885 = dma.vmem_to_hbm [thread:$0]  %s883_s16, 64, %s1938_s18, [#allocation13]  }
 0x88a   :  { %s1334_s17 = scalar_lea.vmem %s903_s14, 64  ;;  %p1339_p3 = scmp.lt.s32.totalorder %s903_s14, %s903_s14 }
 0x88b   :  { %p1335_p2 = scmp.ne.s32.totalorder %s903_s14, %s1334_s17  ;;  %p1340_p4 = scmp.lt.s32.totalorder %s1334_s17, %s1334_s17 }
 0x88d   :  { %p1341_p5 = por %p1340_p4, %p1339_p3 }
 0x88f   :  { %p1342_p6 = pnand %p1341_p5, %p1335_p2 }
 0x891   :  { %1345 = shalt.err (!%p1342_p6)
}
 0x892   :  { %s1346_s5 = scalar_lea.hbm %s1940_s20, 64 }
 0x893   :  { %p1347_p7 = scmp.ne.s32.totalorder %s1940_s20, %s1346_s5  ;;  %p1350_p8 = scmp.lt.u32.totalorder %s1346_s5, %s1940_s20 }
 0x895   :  { %p1352_p9 = pnand %p1350_p8, %p1347_p7 }
 0x897   :  { %1355 = shalt.err (!%p1352_p9)
}
 0x898   :  { %905 = dma.vmem_to_hbm [thread:$0]  %s903_s14, 64, %s1940_s20, [#allocation16]  }
 0x899   :  { %s1436_s26 = smov [#allocation20]  }
 0x89a   :  { %s922_s2 = sshll.u32 %s1436_s26, 4  ;;  %s923_s2 = int_to_ptr.vmem [resolvable:$true] %s922_s2 }
 0x89b   :  { %s1356_s19 = scalar_lea.vmem %s923_s2, 64  ;;  %p1361_p11 = scmp.lt.s32.totalorder %s923_s2, %s923_s2 }
 0x89c   :  { %p1357_p10 = scmp.ne.s32.totalorder %s923_s2, %s1356_s19  ;;  %p1362_p12 = scmp.lt.s32.totalorder %s1356_s19, %s1356_s19 }
 0x89e   :  { %p1363_p13 = por %p1362_p12, %p1361_p11 }
 0x8a0   :  { %p1364_p0 = pnand %p1363_p13, %p1357_p10 }
 0x8a2   :  { %1367 = shalt.err (!%p1364_p0)
}
 0x8a3   :  { %s1368_s9 = scalar_lea.hbm %s1942_s22, 64 }
 0x8a4   :  { %p1369_p1 = scmp.ne.s32.totalorder %s1942_s22, %s1368_s9  ;;  %p1372_p2 = scmp.lt.u32.totalorder %s1368_s9, %s1942_s22 }
 0x8a6   :  { %p1374_p3 = pnand %p1372_p2, %p1369_p1 }
 0x8a8   :  { %1377 = shalt.err (!%p1374_p3)
}
 0x8a9   :  { %925 = dma.vmem_to_hbm [thread:$0]  %s923_s2, 64, %s1942_s22, [#allocation19]   ;;  %v964_v0 = vld [vmem:[#allocation10] ss:$0 sm:$0xff]  ;;  %vm806_vm1 = vcmask 257024  }
 0x8aa   :  { %s1437_s0 = smov [#allocation11]  }
 0x8ab   :  { %s862_s23 = sshll.u32 %s1437_s0, 4  ;;  %s863_s23 = int_to_ptr.vmem [resolvable:$true] %s862_s23 }
 0x8ac   :  { %s1378_s30 = scalar_lea.vmem %s863_s23, 64  ;;  %p1383_p5 = scmp.lt.s32.totalorder %s863_s23, %s863_s23 }
 0x8ad   :  { %p1379_p4 = scmp.ne.s32.totalorder %s863_s23, %s1378_s30  ;;  %p1384_p6 = scmp.lt.s32.totalorder %s1378_s30, %s1378_s30 }
 0x8af   :  { %p1385_p7 = por %p1384_p6, %p1383_p5 }
 0x8b1   :  { %p1386_p8 = pnand %p1385_p7, %p1379_p4 }
 0x920   :  { %v802_v10 = vpop.f32.mrb[4].mxu0 }
 0x921   :  { %v803_v2 = vadd.f32 %v964_v0, %v802_v10  ;;  %v1031_v27 = vpop.f32.mrb[5].mxu0 }
 0x923   :  { %807 = vst.msk [vmem:[#allocation11] sm:$0xf] %vm806_vm1, %v803_v2 }
 0x924   :  { %1389 = shalt.err (!%p1386_p8)
}
 0x925   :  { %s1960_s12 = sld [smem:[#allocation35_spill]] }
 0x92b   :  { %s1390_s22 = scalar_lea.hbm %s1960_s12, 64 }
 0x92c   :  { %p1391_p9 = scmp.ne.s32.totalorder %s1960_s12, %s1390_s22  ;;  %p1394_p10 = scmp.lt.u32.totalorder %s1390_s22, %s1960_s12 }
 0x92e   :  { %p1396_p11 = pnand %p1394_p10, %p1391_p9 }
 0x930   :  { %1399 = shalt.err (!%p1396_p11)
}
 0x931   :  { %865 = dma.vmem_to_hbm [thread:$0]  %s863_s23, 64, %s1960_s12, [#allocation4]  }
 0x932   :  { %1406 = dma.done.wait [#allocation4], 64  }
 0x933   :  { %1407 = vsyncadd [#allocation4], 4294967232 }
 0x934   :  { %1408 = dma.done.wait [#allocation13], 128  }
 0x935   :  { %1409 = vsyncadd [#allocation13], 4294967168 }
 0x936   :  { %1410 = dma.done.wait [#allocation16], 128  }
 0x937   :  { %1411 = vsyncadd [#allocation16], 4294967168 }
 0x938   :  { %1412 = dma.done.wait [#allocation19], 128  }
 0x939   :  { %1413 = vsyncadd [#allocation19], 4294967168 }
 0x93a   :  { %947 = vsyncpa [#allocation3], 1 }
 0x93b   :  { %948 = vsyncpa [#allocation6], 1 }
 0x93c   :  { %949 = vsyncpa [#allocation9], 1 }
 0x93d   :  { %950 = vsyncpa [#allocation4], 1 }
 0x93e   :  { %951 = vsyncpa [#allocation13], 1 }
 0x93f   :  { %952 = vsyncpa [#allocation16], 1 }
 0x940   :  { %953 = vsyncpa [#allocation19], 1 }

</bundles_post_ra>
